<compile_context>
chip_gen: v5e
topology: v5e:2x2
jax: 0.10.0
libtpu: 0.0.40
codegen_flags: <defaults>
</compile_context>

<pallas_src>
import functools

import jax
import jax.numpy as jnp
from jax.experimental import pallas as pl
from jax.experimental.pallas import tpu as pltpu


def _rms_norm_kernel(x_ref, w_ref, o_ref, *, eps, inv_dim):
    # x_ref: (tm, dim) tile, w_ref: (1, dim), o_ref: (tm, dim)
    x = x_ref[...].astype(jnp.float32)
    w = w_ref[...].astype(jnp.float32)            # (1, dim) — broadcasts over rows
    # sum * (1/dim): guarantees a VPU multiply by a compile-time constant
    # instead of a per-tile vector divide.
    ms = jnp.sum(x * x, axis=-1, keepdims=True) * inv_dim   # (tm, 1)
    inv = jax.lax.rsqrt(ms + eps)                 # EUP rsqrt
    o_ref[...] = (x * inv * w).astype(o_ref.dtype)


def _choose_row_tile(rows, dim, dtype):
    """Largest row tile that fits a conservative VMEM budget (double-buffered
    input + output), rounded to the (8, 128) sublane constraint."""
    bpe = jnp.dtype(dtype).itemsize
    # Pipeline keeps 2 input buffers + 2 output buffers of (tm, dim) resident.
    bytes_per_row = 4 * dim * bpe
    vmem_budget = 24 * 1024 * 1024  # conservative: fits v7x (64 MiB/TC) too
    tm = vmem_budget // max(bytes_per_row, 1)
    tm = max(8, min(int(tm), 1024))
    tm = (tm // 8) * 8
    if rows <= tm:
        # Single block: block second-to-last dim == full array dim, always legal.
        return rows
    return tm


def rms_norm(x, weight, eps=1e-5):
    """x: (..., dim), weight: (dim,). Returns same shape/dtype as x."""
    orig_shape = x.shape
    dim = orig_shape[-1]
    rows = 1
    for s in orig_shape[:-1]:
        rows *= s
    x2 = x.reshape(rows, dim)
    w2 = weight.reshape(1, dim)

    tm = _choose_row_tile(rows, dim, x.dtype)
    grid = (pl.cdiv(rows, tm),)

    # Scoped-VMEM limit sized to the chosen tile (double-buffered in + out,
    # plus weight and slack), capped well below physical VMEM on all chips.
    bpe = jnp.dtype(x.dtype).itemsize
    needed = 4 * tm * dim * bpe + 2 * dim * bpe + (4 << 20)
    vmem_limit = int(min(max(needed, 16 << 20), 48 << 20))

    kernel = functools.partial(
        _rms_norm_kernel, eps=float(eps), inv_dim=1.0 / float(dim)
    )

    out = pl.pallas_call(
        kernel,
        out_shape=jax.ShapeDtypeStruct((rows, dim), x.dtype),
        grid_spec=pltpu.PrefetchScalarGridSpec(
            num_scalar_prefetch=0,
            grid=grid,
            in_specs=[
                pl.BlockSpec((tm, dim), lambda i: (i, 0)),
                pl.BlockSpec((1, dim), lambda i: (0, 0)),
            ],
            out_specs=pl.BlockSpec((tm, dim), lambda i: (i, 0)),
        ),
        compiler_params=pltpu.CompilerParams(
            dimension_semantics=("parallel",),
            vmem_limit_bytes=vmem_limit,
        ),
    )(x2, w2)

    return out.reshape(orig_shape)


def rms_norm_ref(x, weight, eps=1e-5):
    xf = x.astype(jnp.float32)
    ms = jnp.mean(xf * xf, axis=-1, keepdims=True)
    y = xf * jax.lax.rsqrt(ms + eps) * weight.astype(jnp.float32)
    return y.astype(x.dtype)


if __name__ == "__main__":
    key = jax.random.PRNGKey(0)
    batch, seq, dim = 2, 8, 32
    x = jax.random.normal(key, (batch, seq, dim), dtype=jnp.float32)
    # Deterministic parameter init, matching nn.init.ones_(self.weight)
    weight = jnp.ones((dim,), dtype=jnp.float32)

    out = rms_norm(x, weight, eps=1e-5)
    out = jax.block_until_ready(out)

    ref = rms_norm_ref(x, weight, eps=1e-5)
    assert out.shape == x.shape and out.dtype == x.dtype
    assert jnp.allclose(out, ref, atol=1e-5, rtol=1e-5), "mismatch vs reference"
    print("KERNEL_OK")
</pallas_src>

<mosaic_0001>
module attributes {stable_mosaic.version = 11 : i64} {
  func.func @_rms_norm_kernel(%arg0: i32, %arg1: memref<16x32xf32, #tpu.memory_space<vmem>>, %arg2: memref<1x32xf32, #tpu.memory_space<vmem>>, %arg3: memref<16x32xf32, #tpu.memory_space<vmem>>) attributes {dimension_semantics = [#tpu.dimension_semantics<parallel>], iteration_bounds = array<i64: 1>, scalar_prefetch = 0 : i64, scratch_operands = 0 : i64, tpu.core_type = #tpu.core_type<tc>, window_params = [{transform_indices = @transform_0, window_bounds = array<i64: 16, 32>}, {pipeline_mode = #tpu.pipeline_mode<synchronous>, transform_indices = @transform_1, window_bounds = array<i64: 1, 32>}, {transform_indices = @transform_2, window_bounds = array<i64: 16, 32>}]} {
    %c0 = arith.constant 0 : index
    %c0_0 = arith.constant 0 : index
    %0 = vector.load %arg1[%c0, %c0_0] : memref<16x32xf32, #tpu.memory_space<vmem>>, vector<16x32xf32>
    %c0_1 = arith.constant 0 : index
    %c0_2 = arith.constant 0 : index
    %1 = vector.load %arg2[%c0_1, %c0_2] : memref<1x32xf32, #tpu.memory_space<vmem>>, vector<1x32xf32>
    %2 = arith.mulf %0, %0 : vector<16x32xf32>
    %cst = arith.constant dense<0.000000e+00> : vector<16xf32>
    %3 = vector.multi_reduction <add>, %2, %cst [1] : vector<16x32xf32> to vector<16xf32>
    %4 = vector.shape_cast %3 : vector<16xf32> to vector<16x1xf32>
    %cst_3 = arith.constant 3.125000e-02 : f32
    %5 = vector.broadcast %cst_3 : f32 to vector<16x1xf32>
    %6 = arith.mulf %4, %5 : vector<16x1xf32>
    %cst_4 = arith.constant 9.99999974E-6 : f32
    %7 = vector.broadcast %cst_4 : f32 to vector<16x1xf32>
    %8 = arith.addf %6, %7 : vector<16x1xf32>
    %9 = math.rsqrt %8 : vector<16x1xf32>
    %10 = vector.broadcast %9 : vector<16x1xf32> to vector<16x32xf32>
    %11 = arith.mulf %0, %10 : vector<16x32xf32>
    %12 = vector.broadcast %1 : vector<1x32xf32> to vector<16x32xf32>
    %13 = arith.mulf %11, %12 : vector<16x32xf32>
    %c0_5 = arith.constant 0 : index
    %c0_6 = arith.constant 0 : index
    %14 = vector.load %arg3[%c0_5, %c0_6] : memref<16x32xf32, #tpu.memory_space<vmem>>, vector<16x32xf32>
    tpu.vector_store %arg3[%c0_5, %c0_6], %13 {strides = array<i32>} : memref<16x32xf32, #tpu.memory_space<vmem>>, vector<16x32xf32>,
    return
  }
  func.func @transform_0(%arg0: i32) -> (i32, i32) {
    %c0_i32 = arith.constant 0 : i32
    %c0_i32_0 = arith.constant 0 : i32
    return %arg0, %c0_i32 : i32, i32
  }
  func.func @transform_1(%arg0: i32) -> (i32, i32) {
    %c0_i32 = arith.constant 0 : i32
    %c0_i32_0 = arith.constant 0 : i32
    %c0_i32_1 = arith.constant 0 : i32
    return %c0_i32, %c0_i32_0 : i32, i32
  }
  func.func @transform_2(%arg0: i32) -> (i32, i32) {
    %c0_i32 = arith.constant 0 : i32
    %c0_i32_0 = arith.constant 0 : i32
    return %arg0, %c0_i32 : i32, i32
  }
}

</mosaic_0001>

<bundles_post_ra>
// kernel: tpu_custom_call.1
= control target key start
LH: loop header
LB: loop body
LE: loop exit
PB: predicated region body
PF: predicated region fallthrough
CT: control target
= control target key end

     0   :  { %7 = vsyncpa [#allocation3], 0  ;;  %s234_s0 = inlined_call_operand.hbm [shape: f32[16,32], index: 0, kind: input, shape index: {}]   ;;  %s235_s1 = inlined_call_operand.hbm [shape: f32[1,32], index: 1, kind: input, shape index: {}]   ;;  %s236_s2 = inlined_call_operand.hbm [shape: f32[16,32], index: 2, kind: output, shape index: {}]  }
   0x1   :  { %8 = vsyncpa [#allocation6], 0 }
   0x2   :  { %9 = vsyncpa [#allocation4], 0  ;;  %s14_s11 = sshll.u32 %s234_s0, 4  ;;  %s195_s12 = smov [#allocation2]   ;;  %s15_s11 = int_to_ptr.hbm [resolvable:$true] %s14_s11 }
   0x3   :  { %s16_s13 = sshll.u32 %s195_s12, 4  ;;  %s28_s16 = sshll.u32 %s235_s1, 4  ;;  %s17_s13 = int_to_ptr.vmem [resolvable:$true] %s16_s13  ;;  %s29_s16 = int_to_ptr.hbm [resolvable:$true] %s28_s16 }
   0x4   :  { %s196_s17 = smov 128   ;;  %s197_s18 = smov 8  }
   0x5   :  { %22 = dma.hbm_to_vmem [thread:$0]  %s15_s11, 256, %s17_s13, [#allocation3], %s196_s17, %s196_s17, %s197_s18  }
   0x6   :  { %s198_s19 = smov [#allocation5]  }
   0x7   :  { %s30_s20 = sshll.u32 %s198_s19, 4  ;;  %s31_s20 = int_to_ptr.vmem [resolvable:$true] %s30_s20 }
   0x8   :  { %33 = dma.hbm_to_vmem [thread:$0]  %s29_s16, 16, %s31_s20, [#allocation6]  }
   0x9   :  { %189 = dma.done.wait [#allocation3], 256  }
   0xa   :  { %190 = vsyncadd [#allocation3], 4294967040 }
   0xb   :  { %191 = dma.done.wait [#allocation6], 16  }
   0xc   :  { %192 = vsyncadd [#allocation6], 4294967280  ;;  %v42_v0 = vld [vmem:[#allocation2] sm:$0xff]  ;;  %vm47_vm0 = vcmask 261120   ;;  %v43_v2 = vld [vmem:[#allocation2 + $0x8] sm:$0xff]  ;;  %s199_s0 = smov [#allocation7]  }
   0xd   :  { %v45_v1 = vmul.f32 %v42_v0, %v42_v0  ;;  %v46_v4 = vmul.f32 %v43_v2, %v43_v2  ;;  %v112_v20 = vld [vmem:[#allocation5] ss:$0 sm:$0xff]  ;;  %s91_s1 = sshll.u32 %s199_s0, 4  ;;  %s93_s23 = sshll.u32 %s236_s2, 4  ;;  %s92_s1 = int_to_ptr.vmem [resolvable:$true] %s91_s1  ;;  %s94_s23 = int_to_ptr.hbm [resolvable:$true] %s93_s23 }
   0xf   :  { %v48_v3 = vsel %vm47_vm0, %v45_v1, 0.0  ;;  %v51_v5 = vsel %vm47_vm0, %v46_v4, 0.0 }
  0x10   :  { %49 = vadd.xlane.f32.xlu0 %v48_v3 }
  0x18   :  { %52 = vadd.xlane.f32.xlu0 %v51_v5 }
  0x83   :  { %v50_v6 = vpop.xlane.xlu0 %49 }
  0x84   :  { %v54_v7 = vmul.f32 0.03125, %v50_v6 }
  0x86   :  { %v56_v8 = vadd.f32 1e-05, %v54_v7 }
  0x88   :  { %113 = vrsqrt.f32 %v56_v8  ;;  %vm64_vm2 = vweird.f32 %v56_v8 }
  0x8b   :  { %v53_v9 = vpop.xlane.xlu0 %52 }
  0x8c   :  { %v55_v10 = vmul.f32 0.03125, %v53_v9 }
  0x8e   :  { %v114_v11 = vpop.eup %113  ;;  %v57_v12 = vadd.f32 1e-05, %v55_v10 }
  0x8f   :  { %v59_v13 = vmul.f32 %v114_v11, %v56_v8  ;;  %vm65_vm1 = vweird.f32 %v114_v11 }
  0x90   :  { %115 = vrsqrt.f32 %v57_v12  ;;  %vm66_vm3 = vmor %vm64_vm2, %vm65_vm1  ;;  %vm74_vm5 = vweird.f32 %v57_v12 }
  0x91   :  { %v60_v14 = vmul.f32 %v114_v11, %v59_v13 }
  0x93   :  { %v61_v15 = vmul.f32 0.5, %v60_v14 }
  0x95   :  { %v62_v16 = vsub.f32 1.5, %v61_v15 }
  0x96   :  { %v116_v17 = vpop.eup %115 }
  0x97   :  { %v63_v18 = vmul.f32 %v114_v11, %v62_v16  ;;  %v69_v19 = vmul.f32 %v116_v17, %v57_v12  ;;  %vm75_vm4 = vweird.f32 %v116_v17 }
  0x98   :  { %vm76_vm6 = vmor %vm74_vm5, %vm75_vm4 }
  0x99   :  { %v67_v21 = vsel %vm66_vm3, %v114_v11, %v63_v18  ;;  %v70_v22 = vmul.f32 %v116_v17, %v69_v19 }
  0x9a   :  { %v78_v23 = vmul.f32 %v67_v21, %v42_v0 }
  0x9b   :  { %v71_v24 = vmul.f32 0.5, %v70_v22 }
  0x9c   :  { %v83_v25 = vmul.f32 %v112_v20, %v78_v23 }
  0x9d   :  { %v72_v26 = vsub.f32 1.5, %v71_v24 }
  0x9e   :  { %85 = vst.msk [vmem:[#allocation7] sm:$0xff] %vm47_vm0, %v83_v25 }
  0x9f   :  { %v73_v27 = vmul.f32 %v116_v17, %v72_v26 }
  0xa1   :  { %v77_v28 = vsel %vm76_vm6, %v116_v17, %v73_v27 }
  0xa2   :  { %v79_v29 = vmul.f32 %v77_v28, %v43_v2 }
  0xa4   :  { %v84_v30 = vmul.f32 %v112_v20, %v79_v29 }
  0xa6   :  { %86 = vst.msk [vmem:[#allocation7 + $0x8] sm:$0xff] %vm47_vm0, %v84_v30 }
  0xa7   :  { %99 = dma.vmem_to_hbm [thread:$0]  %s92_s1, 256, %s94_s23, [#allocation4], %s196_s17, %s196_s17, %s197_s18  }
  0xa8   :  { %193 = dma.done.wait [#allocation4], 256  }
  0xa9   :  { %194 = vsyncadd [#allocation4], 4294967040 }
  0xaa   :  { %104 = vsyncpa [#allocation3], 1 }
  0xab   :  { %105 = vsyncpa [#allocation6], 1 }
  0xac   :  { %106 = vsyncpa [#allocation4], 1 }

</bundles_post_ra>
